<compile_context>
chip_gen: v7x
topology: tpu7x:2x2x1
jax: 0.10.0
libtpu: 0.0.40
codegen_flags: <defaults>
</compile_context>

<pallas_src>
import functools

import jax
import jax.numpy as jnp
from jax import lax
from jax.experimental import pallas as pl
from jax.experimental.pallas import tpu as pltpu

LANES = 128
ACC_ROWS = 8            # accumulator sublanes (one f32 vreg worth of rows)
CHUNK_ROWS = 256        # inner accumulate chunk: (256, 128) f32 = 128 KiB
MAX_TILE_ROWS = 8192    # (8192, 128) f32 = 4 MiB per input per pipeline buffer
NUM_SLICES = 2          # leading parallel grid axis (both TCs on v7x)


def _round_up(x, m):
    return ((x + m - 1) // m) * m


def _rmse_partial_kernel(yhat_ref, y_ref, acc_ref, *, tile_rows, chunk,
                         n_blocks, blocks_per_slice, last_valid, has_phantom):
    """Accumulate per-slice partial sum of squared diffs into acc_ref (8,128)."""
    s = pl.program_id(0)
    j = pl.program_id(1)
    b = s * blocks_per_slice + j  # global block index (may be a phantom block)

    # Zero this slice's accumulator on its first step.
    @pl.when(j == 0)
    def _():
        acc_ref[...] = jnp.zeros_like(acc_ref)

    def chunk_update(r0, valid_rows=None):
        # Load one (chunk, 128) row-chunk of each input, upcast on the VPU,
        # square the diff, fold into the (8, 128) running accumulator.
        dy = (yhat_ref[pl.ds(r0, chunk), :].astype(jnp.float32)
              - y_ref[pl.ds(r0, chunk), :].astype(jnp.float32))
        if valid_rows is not None:  # static: only the last partial chunk
            row = lax.broadcasted_iota(jnp.int32, (chunk, LANES), 0)
            dy = jnp.where(row < valid_rows, dy, jnp.float32(0.0))
        d2 = dy * dy
        acc_ref[...] += jnp.sum(d2.reshape(chunk // 8, ACC_ROWS, LANES), axis=0)

    def accumulate_chunks(n_chunks):
        # n_chunks is a static Python int.
        if n_chunks == 1:
            chunk_update(0)
        elif n_chunks > 1:
            def body(c, carry):
                chunk_update(pl.multiple_of(c * chunk, chunk))
                return carry
            lax.fori_loop(0, n_chunks, body, 0)

    def full_block():
        accumulate_chunks(tile_rows // chunk)

    need_row_mask = last_valid != tile_rows  # static

    if need_row_mask:
        def last_block():
            n_full = last_valid // chunk
            accumulate_chunks(n_full)          # unmasked full chunks
            rem = last_valid % chunk
            if rem:                            # single masked boundary chunk
                chunk_update(n_full * chunk, valid_rows=rem)

        @pl.when(b < n_blocks - 1)
        def _():
            full_block()

        @pl.when(b == n_blocks - 1)
        def _():
            last_block()
        # Phantom blocks (b >= n_blocks) hit neither branch -> contribute 0.
    else:
        if has_phantom:
            @pl.when(b < n_blocks)
            def _():
                full_block()
        else:
            full_block()


def rmse_loss(yhat, y, eps=1e-6, max_tile_rows=MAX_TILE_ROWS):
    """sqrt(mean((yhat - y)**2) + eps), matching torch RMSELoss.forward."""
    assert yhat.shape == y.shape, "yhat and y must have the same shape"
    n = yhat.size
    if n == 0:
        return jnp.sqrt(jnp.float32(eps))

    # Keep native dtypes through the DMA; upcast happens inside the kernel.
    yh = jnp.ravel(yhat)
    yy = jnp.ravel(y)

    rows = n // LANES
    n_main = rows * LANES

    # Ragged tail (< 128 elements): tiny plain-jnp sum, no big pad copy.
    if n_main < n:
        th = yh[n_main:].astype(jnp.float32)
        ty = yy[n_main:].astype(jnp.float32)
        tail_sum = jnp.sum((th - ty) * (th - ty))
    else:
        tail_sum = jnp.float32(0.0)

    if rows == 0:
        total = tail_sum
    else:
        yh2 = yh[:n_main].reshape(rows, LANES)
        yy2 = yy[:n_main].reshape(rows, LANES)

        # Sublane multiple from the *widest* packing requirement of the two
        # native dtypes (f32: 8, bf16/f16: 16, int8/fp8: 32).
        sub = max(8,
                  32 // jnp.dtype(yh2.dtype).itemsize,
                  32 // jnp.dtype(yy2.dtype).itemsize)

        tile_rows = _round_up(min(max_tile_rows, rows), sub)
        if tile_rows > CHUNK_ROWS:
            tile_rows = _round_up(tile_rows, CHUNK_ROWS)
            chunk = CHUNK_ROWS
        else:
            chunk = tile_rows

        n_blocks = pl.cdiv(rows, tile_rows)
        last_valid = rows - (n_blocks - 1) * tile_rows   # static valid rows in last block
        num_slices = NUM_SLICES if n_blocks >= 2 else 1
        blocks_per_slice = pl.cdiv(n_blocks, num_slices)
        has_phantom = num_slices * blocks_per_slice > n_blocks

        kernel = functools.partial(
            _rmse_partial_kernel,
            tile_rows=tile_rows,
            chunk=chunk,
            n_blocks=n_blocks,
            blocks_per_slice=blocks_per_slice,
            last_valid=last_valid,
            has_phantom=has_phantom,
        )

        def in_map(s_i, j_i):
            # Clamp phantom block indices so the DMA stays in bounds; their
            # contribution is skipped inside the kernel.
            return (jnp.minimum(s_i * blocks_per_slice + j_i, n_blocks - 1), 0)

        partials = pl.pallas_call(
            kernel,
            out_shape=jax.ShapeDtypeStruct((num_slices * ACC_ROWS, LANES),
                                           jnp.float32),
            grid_spec=pltpu.PrefetchScalarGridSpec(
                num_scalar_prefetch=0,
                grid=(num_slices, blocks_per_slice),
                in_specs=[
                    pl.BlockSpec((tile_rows, LANES), in_map),
                    pl.BlockSpec((tile_rows, LANES), in_map),
                ],
                out_specs=pl.BlockSpec((ACC_ROWS, LANES),
                                       lambda s_i, j_i: (s_i, 0)),
            ),
            compiler_params=pltpu.CompilerParams(
                dimension_semantics=("parallel", "arbitrary"),
                vmem_limit_bytes=40 * 1024 * 1024,
            ),
        )(yh2, yy2)

        # Cross-slice / cross-lane reduce + finalize in XLA (negligible cost).
        total = jnp.sum(partials) + tail_sum

    return jnp.sqrt(total / jnp.float32(n) + jnp.float32(eps))


if __name__ == "__main__":
    key = jax.random.PRNGKey(0)
    k1, k2, k3, k4, k5, k6 = jax.random.split(key, 6)

    def ref_rmse(a, b, eps=1e-6):
        d = a.astype(jnp.float32) - b.astype(jnp.float32)
        return jnp.sqrt(jnp.mean(d * d) + eps)

    # 1) Lane-aligned NCHW input (2, 4, 16, 16).
    yhat = jax.random.normal(k1, (2, 4, 16, 16), dtype=jnp.float32)
    y = jax.random.normal(k2, (2, 4, 16, 16), dtype=jnp.float32)
    out = rmse_loss(yhat, y)
    jax.block_until_ready(out)
    assert jnp.allclose(out, ref_rmse(yhat, y), rtol=2e-5, atol=1e-6), \
        (out, ref_rmse(yhat, y))

    # 2) Ragged shape (size not a multiple of 128) -> wrapper tail path.
    yhat_r = jax.random.normal(k3, (3, 5, 7, 11), dtype=jnp.float32)
    y_r = jax.random.normal(k4, (3, 5, 7, 11), dtype=jnp.float32)
    out_r = rmse_loss(yhat_r, y_r)
    jax.block_until_ready(out_r)
    assert jnp.allclose(out_r, ref_rmse(yhat_r, y_r), rtol=2e-5, atol=1e-6), \
        (out_r, ref_rmse(yhat_r, y_r))

    # 3) Mixed dtypes (bf16 prediction vs f32 target): native-dtype DMA path.
    yhat_b = yhat.astype(jnp.bfloat16)
    out_b = rmse_loss(yhat_b, y)
    jax.block_until_ready(out_b)
    assert jnp.allclose(out_b, ref_rmse(yhat_b, y), rtol=2e-5, atol=1e-6), \
        (out_b, ref_rmse(yhat_b, y))

    # 4) Multi-block / two-slice / chunked-loop / partial-last-block /
    #    phantom-block paths, forced at small shapes via max_tile_rows.
    yhat_m = jax.random.normal(k5, (2, 4, 130, 80), dtype=jnp.float32)  # 650 rows
    y_m = jax.random.normal(k6, (2, 4, 130, 80), dtype=jnp.float32)
    out_m1 = rmse_loss(yhat_m, y_m, max_tile_rows=512)  # 2 blocks, fori chunks, row mask
    out_m2 = rmse_loss(yhat_m, y_m, max_tile_rows=256)  # 3 blocks, phantom block on slice 1
    jax.block_until_ready((out_m1, out_m2))
    ref_m = ref_rmse(yhat_m, y_m)
    assert jnp.allclose(out_m1, ref_m, rtol=2e-5, atol=1e-6), (out_m1, ref_m)
    assert jnp.allclose(out_m2, ref_m, rtol=2e-5, atol=1e-6), (out_m2, ref_m)

    print("KERNEL_OK")
</pallas_src>

<mosaic_0001>
module attributes {stable_mosaic.version = 11 : i64} {
  func.func @_rmse_partial_kernel(%arg0: i32, %arg1: i32, %arg2: memref<16x128xf32, #tpu.memory_space<vmem>>, %arg3: memref<16x128xf32, #tpu.memory_space<vmem>>, %arg4: memref<8x128xf32, #tpu.memory_space<vmem>>) attributes {dimension_semantics = [#tpu.dimension_semantics<parallel>, #tpu.dimension_semantics<arbitrary>], iteration_bounds = array<i64: 1, 1>, scalar_prefetch = 0 : i64, scratch_operands = 0 : i64, tpu.core_type = #tpu.core_type<tc>, window_params = [{transform_indices = @transform_0, window_bounds = array<i64: 16, 128>}, {transform_indices = @transform_1, window_bounds = array<i64: 16, 128>}, {transform_indices = @transform_2, window_bounds = array<i64: 8, 128>}]} {
    %c0_i32 = arith.constant 0 : i32
    %0 = arith.cmpi eq, %arg1, %c0_i32 : i32
    %1 = arith.extui %0 : i1 to i32
    %c0_i32_0 = arith.constant 0 : i32
    %2 = arith.cmpi ne, %1, %c0_i32_0 : i32
    scf.if %2 {
      %cst_8 = arith.constant 0.000000e+00 : f32
      %12 = vector.broadcast %cst_8 : f32 to vector<8x128xf32>
      %c0_9 = arith.constant 0 : index
      %c0_10 = arith.constant 0 : index
      %13 = vector.load %arg4[%c0_9, %c0_10] : memref<8x128xf32, #tpu.memory_space<vmem>>, vector<8x128xf32>
      tpu.vector_store %arg4[%c0_9, %c0_10], %12 {strides = array<i32>} : memref<8x128xf32, #tpu.memory_space<vmem>>, vector<8x128xf32>,
    } else {
    }
    %c0 = arith.constant 0 : index
    %c0_1 = arith.constant 0 : index
    %3 = vector.load %arg2[%c0, %c0_1] : memref<16x128xf32, #tpu.memory_space<vmem>>, vector<16x128xf32>
    %c0_2 = arith.constant 0 : index
    %c0_3 = arith.constant 0 : index
    %4 = vector.load %arg3[%c0_2, %c0_3] : memref<16x128xf32, #tpu.memory_space<vmem>>, vector<16x128xf32>
    %5 = arith.subf %3, %4 : vector<16x128xf32>
    %6 = arith.mulf %5, %5 : vector<16x128xf32>
    %c0_4 = arith.constant 0 : index
    %c0_5 = arith.constant 0 : index
    %7 = vector.load %arg4[%c0_4, %c0_5] : memref<8x128xf32, #tpu.memory_space<vmem>>, vector<8x128xf32>
    %8 = vector.shape_cast %6 : vector<16x128xf32> to vector<2x8x128xf32>
    %cst = arith.constant dense<0.000000e+00> : vector<8x128xf32>
    %9 = vector.multi_reduction <add>, %8, %cst [0] : vector<2x8x128xf32> to vector<8x128xf32>
    %10 = arith.addf %7, %9 : vector<8x128xf32>
    %c0_6 = arith.constant 0 : index
    %c0_7 = arith.constant 0 : index
    %11 = vector.load %arg4[%c0_6, %c0_7] : memref<8x128xf32, #tpu.memory_space<vmem>>, vector<8x128xf32>
    tpu.vector_store %arg4[%c0_6, %c0_7], %10 {strides = array<i32>} : memref<8x128xf32, #tpu.memory_space<vmem>>, vector<8x128xf32>,
    return
  }
  func.func @transform_0(%arg0: i32, %arg1: i32) -> (i32, i32) {
    %c1_i32 = arith.constant 1 : i32
    %0 = arith.muli %arg0, %c1_i32 : i32
    %1 = arith.addi %0, %arg1 : i32
    %c0_i32 = arith.constant 0 : i32
    %2 = arith.minsi %1, %c0_i32 : i32
    %c0_i32_0 = arith.constant 0 : i32
    %c0_i32_1 = arith.constant 0 : i32
    return %2, %c0_i32_0 : i32, i32
  }
  func.func @transform_1(%arg0: i32, %arg1: i32) -> (i32, i32) {
    %c1_i32 = arith.constant 1 : i32
    %0 = arith.muli %arg0, %c1_i32 : i32
    %1 = arith.addi %0, %arg1 : i32
    %c0_i32 = arith.constant 0 : i32
    %2 = arith.minsi %1, %c0_i32 : i32
    %c0_i32_0 = arith.constant 0 : i32
    %c0_i32_1 = arith.constant 0 : i32
    return %2, %c0_i32_0 : i32, i32
  }
  func.func @transform_2(%arg0: i32, %arg1: i32) -> (i32, i32) {
    %c0_i32 = arith.constant 0 : i32
    %c0_i32_0 = arith.constant 0 : i32
    return %arg0, %c0_i32 : i32, i32
  }
}

</mosaic_0001>

<bundles_post_ra>
// kernel: tpu_custom_call.1
= control target key start
LH: loop header
LB: loop body
LE: loop exit
PB: predicated region body
PF: predicated region fallthrough
CT: control target
= control target key end

     0   :  { %7 = vsyncpa [#allocation3], 0  ;;  %s231_s0 = inlined_call_operand.hbm [shape: f32[16,128], index: 0, kind: input, shape index: {}]   ;;  %s232_s1 = inlined_call_operand.hbm [shape: f32[16,128], index: 1, kind: input, shape index: {}]   ;;  %s233_s2 = inlined_call_operand.hbm [shape: f32[8,128], index: 2, kind: output, shape index: {}]  }
   0x1   :  { %8 = vsyncpa [#allocation6], 0 }
   0x2   :  { %9 = vsyncpa [#allocation4], 0  ;;  %s175_s9 = smov [#allocation2]   ;;  %s103_s13 = scalar_lea.hbm %s231_s0, 256 }
   0x3   :  { %s21_s10 = sshll.u32 %s175_s9, 4  ;;  %p104_p0 = scmp.ne.s32.totalorder %s231_s0, %s103_s13  ;;  %s22_s10 = int_to_ptr.vmem [resolvable:$true] %s21_s10 }
   0x4   :  { %p107_p1 = scmp.lt.u32.totalorder %s103_s13, %s231_s0 }
   0x6   :  { %p109_p2 = pnand %p107_p1, %p104_p0 }
   0x8   :  { %112 = shalt.err (!%p109_p2)
}
   0x9   :  { %s113_s18 = scalar_lea.vmem %s22_s10, 256  ;;  %p118_p4 = scmp.lt.s32.totalorder %s22_s10, %s22_s10 }
   0xa   :  { %p114_p3 = scmp.ne.s32.totalorder %s22_s10, %s113_s18  ;;  %p119_p5 = scmp.lt.s32.totalorder %s113_s18, %s113_s18 }
   0xc   :  { %p120_p6 = por %p119_p5, %p118_p4 }
   0xe   :  { %p121_p7 = pnand %p120_p6, %p114_p3 }
  0x10   :  { %124 = shalt.err (!%p121_p7)
}
  0x11   :  { %s176_s19 = smov 128   ;;  %s177_s20 = smov 8  }
  0x12   :  { %27 = dma.hbm_to_vmem [thread:$0]  %s231_s0, 256, %s22_s10, [#allocation3], %s176_s19, %s176_s19, %s177_s20  }
  0x13   :  { %s178_s23 = smov [#allocation5]   ;;  %s125_s27 = scalar_lea.hbm %s232_s1, 256 }
  0x14   :  { %s39_s24 = sshll.u32 %s178_s23, 4  ;;  %p126_p8 = scmp.ne.s32.totalorder %s232_s1, %s125_s27  ;;  %s40_s24 = int_to_ptr.vmem [resolvable:$true] %s39_s24 }
  0x15   :  { %p129_p9 = scmp.lt.u32.totalorder %s125_s27, %s232_s1 }
  0x17   :  { %p131_p10 = pnand %p129_p9, %p126_p8 }
  0x19   :  { %134 = shalt.err (!%p131_p10)
}
  0x1a   :  { %s135_s4 = scalar_lea.vmem %s40_s24, 256  ;;  %p140_p12 = scmp.lt.s32.totalorder %s40_s24, %s40_s24 }
  0x1b   :  { %p136_p11 = scmp.ne.s32.totalorder %s40_s24, %s135_s4  ;;  %p141_p13 = scmp.lt.s32.totalorder %s135_s4, %s135_s4 }
  0x1d   :  { %p142_p0 = por %p141_p13, %p140_p12 }
  0x1f   :  { %p143_p1 = pnand %p142_p0, %p136_p11 }
  0x21   :  { %146 = shalt.err (!%p143_p1)
}
  0x22   :  { %45 = dma.hbm_to_vmem [thread:$0]  %s232_s1, 256, %s40_s24, [#allocation6], %s176_s19, %s176_s19, %s177_s20  }
  0x23   :  { %169 = dma.done.wait [#allocation3], 256  }
  0x24   :  { %170 = vsyncadd [#allocation3], 4294967040 }
  0x25   :  { %171 = dma.done.wait [#allocation6], 256  }
  0x26   :  { %172 = vsyncadd [#allocation6], 4294967040  ;;  %v65_v0 = vld [vmem:[#allocation2] sm:$0xff]  ;;  %v66_v1 = vld [vmem:[#allocation2 + $0x8] sm:$0xff]  ;;  %s179_s6 = smov [#allocation7]  }
  0x27   :  { %v67_v2 = vld [vmem:[#allocation5] sm:$0xff]  ;;  %v68_v3 = vld [vmem:[#allocation5 + $0x8] sm:$0xff]  ;;  %s83_s7 = sshll.u32 %s179_s6, 4  ;;  %s84_s7 = int_to_ptr.vmem [resolvable:$true] %s83_s7 }
  0x28   :  { %v69_v4 = vsub.f32 %v65_v0, %v67_v2  ;;  %v70_v5 = vsub.f32 %v66_v1, %v68_v3  ;;  %s147_s8 = scalar_lea.vmem %s84_s7, 128  ;;  %p152_p3 = scmp.lt.s32.totalorder %s84_s7, %s84_s7 }
  0x29   :  { %p148_p2 = scmp.ne.s32.totalorder %s84_s7, %s147_s8  ;;  %p153_p4 = scmp.lt.s32.totalorder %s147_s8, %s147_s8 }
  0x2a   :  { %v71_v6 = vmul.f32 %v69_v4, %v69_v4  ;;  %v72_v7 = vmul.f32 %v70_v5, %v70_v5 }
  0x2b   :  { %p154_p5 = por %p153_p4, %p152_p3 }
  0x2c   :  { %v74_v8 = vadd.f32 %v72_v7, %v71_v6 }
  0x2d   :  { %p155_p6 = pnand %p154_p5, %p148_p2 }
  0x2e   :  { %76 = vst [vmem:[#allocation7] sm:$0xff] %v74_v8 }
  0x2f   :  { %158 = shalt.err (!%p155_p6)
}
  0x30   :  { %s159_s10 = scalar_lea.hbm %s233_s2, 128 }
  0x31   :  { %p160_p7 = scmp.ne.s32.totalorder %s233_s2, %s159_s10  ;;  %p163_p8 = scmp.lt.u32.totalorder %s159_s10, %s233_s2 }
  0x33   :  { %p165_p9 = pnand %p163_p8, %p160_p7 }
  0x35   :  { %168 = shalt.err (!%p165_p9)
}
  0x36   :  { %86 = dma.vmem_to_hbm [thread:$0]  %s84_s7, 128, %s233_s2, [#allocation4]  }
  0x37   :  { %173 = dma.done.wait [#allocation4], 128  }
  0x38   :  { %174 = vsyncadd [#allocation4], 4294967168 }
  0x39   :  { %90 = vsyncpa [#allocation3], 1 }
  0x3a   :  { %91 = vsyncpa [#allocation6], 1 }
  0x3b   :  { %92 = vsyncpa [#allocation4], 1 }

</bundles_post_ra>
